<compile_context>
chip_gen: v7x
topology: tpu7x:2x2x1
jax: 0.10.0
libtpu: 0.0.40
codegen_flags: <defaults>
</compile_context>

<pallas_src>
import jax
import jax.numpy as jnp
from jax.experimental import pallas as pl
from jax.experimental.pallas import tpu as pltpu


def _round_up(x, m):
    return (x + m - 1) // m * m


def _patch_embed_kernel(a_ref, w_ref, b_ref, o_ref):
    # a_ref: (tm, K) bf16 patches, w_ref: (K, Ch) bf16 weights, b_ref: (1, Ch) f32 bias
    acc = jnp.dot(a_ref[...], w_ref[...], preferred_element_type=jnp.float32)
    o_ref[...] = acc + b_ref[...]


def image_embedding_forward(x_nchw, weight, bias, patch_size, *, tm=256):
    """ImageEmbedding forward.

    x_nchw: (N, 3, H, W) float32   (PyTorch NCHW convention)
    weight: (hidden_dim, 3, P, P)  (PyTorch Conv2d weight layout)
    bias:   (hidden_dim,)
    returns (N, (H//P)*(W//P), hidden_dim) float32  -- same as the PyTorch module.
    """
    N, Cin, H, W = x_nchw.shape
    hidden_dim = weight.shape[0]
    P = patch_size
    oh, ow = H // P, W // P
    num_patches = oh * ow
    K = Cin * P * P

    # ---- patchify (wrapper-side layout plumbing; no overlap since stride == kernel)
    # NCHW -> NHWC -> (N, oh, P, ow, P, Cin) -> (N*oh*ow, P*P*Cin)  [order: kh, kw, c]
    x = jnp.transpose(x_nchw, (0, 2, 3, 1))
    x = x.reshape(N, oh, P, ow, P, Cin)
    patches = jnp.transpose(x, (0, 1, 3, 2, 4, 5)).reshape(N * num_patches, K)

    # repack conv weight (oc, c, kh, kw) -> (kh, kw, c, oc) -> (K, hidden_dim)
    w2d = jnp.transpose(weight, (2, 3, 1, 0)).reshape(K, hidden_dim)

    # bf16 MXU operands, f32 accumulation / bias / output
    patches = patches.astype(jnp.bfloat16)
    w2d = w2d.astype(jnp.bfloat16)
    b2d = bias.reshape(1, hidden_dim).astype(jnp.float32)

    M = N * num_patches
    tm = min(tm, _round_up(M, 8))        # second-to-last block dim must be /8
    Mp = _round_up(M, tm)
    if Mp != M:
        patches = jnp.pad(patches, ((0, Mp - M), (0, 0)))

    out = pl.pallas_call(
        _patch_embed_kernel,
        out_shape=jax.ShapeDtypeStruct((Mp, hidden_dim), jnp.float32),
        grid_spec=pltpu.PrefetchScalarGridSpec(
            num_scalar_prefetch=0,
            grid=(Mp // tm,),
            in_specs=[
                pl.BlockSpec((tm, K), lambda i: (i, 0)),           # patch tile
                pl.BlockSpec((K, hidden_dim), lambda i: (0, 0)),   # weights (resident)
                pl.BlockSpec((1, hidden_dim), lambda i: (0, 0)),   # bias (resident)
            ],
            out_specs=pl.BlockSpec((tm, hidden_dim), lambda i: (i, 0)),
        ),
        compiler_params=pltpu.CompilerParams(
            dimension_semantics=("parallel",)),   # shards across v7x's 2 TCs
    )(patches, w2d, b2d)

    return out[:M].reshape(N, num_patches, hidden_dim)


# ---------------- pure-JAX reference (for correctness check) ----------------
def _image_embedding_ref(x, weight, bias, P):
    conv = jax.lax.conv_general_dilated(
        x, weight, (P, P), "VALID",
        dimension_numbers=("NCHW", "OIHW", "NCHW"))
    conv = conv + bias.reshape(1, -1, 1, 1)
    bs, oc, oh, ow = conv.shape
    return jnp.transpose(conv.reshape(bs, oc, oh * ow), (0, 2, 1))


if __name__ == "__main__":
    key = jax.random.PRNGKey(0)
    kx, kw, kb = jax.random.split(key, 3)

    # Small shapes consistent with the module: Conv2d fixes in_channels = 3.
    N, Cin, H, W = 2, 3, 16, 16
    patch_size = 4
    hidden_dim = 128          # lane-dense minor dim (multiple of 128)

    x = jax.random.normal(kx, (N, Cin, H, W), jnp.float32)
    fan_in = Cin * patch_size * patch_size
    bound = 1.0 / (fan_in ** 0.5)           # PyTorch default Conv2d init range
    weight = jax.random.uniform(kw, (hidden_dim, Cin, patch_size, patch_size),
                                jnp.float32, -bound, bound)
    bias = jax.random.uniform(kb, (hidden_dim,), jnp.float32, -bound, bound)

    fwd = jax.jit(image_embedding_forward, static_argnames=("patch_size", "tm"))
    out = jax.block_until_ready(fwd(x, weight, bias, patch_size=patch_size))

    ref = _image_embedding_ref(x, weight, bias, patch_size)

    oh, ow = H // patch_size, W // patch_size
    assert out.shape == (N, oh * ow, hidden_dim), out.shape
    max_err = float(jnp.max(jnp.abs(out - ref)))
    assert jnp.allclose(out, ref, rtol=2e-2, atol=2e-2), max_err
    print("KERNEL_OK")
</pallas_src>

<mosaic_0001>
module attributes {stable_mosaic.version = 11 : i64} {
  func.func @_patch_embed_kernel(%arg0: i32, %arg1: memref<32x48xbf16, #tpu.memory_space<vmem>>, %arg2: memref<48x128xbf16, #tpu.memory_space<vmem>>, %arg3: memref<1x128xf32, #tpu.memory_space<vmem>>, %arg4: memref<32x128xf32, #tpu.memory_space<vmem>>) attributes {dimension_semantics = [#tpu.dimension_semantics<parallel>], iteration_bounds = array<i64: 1>, scalar_prefetch = 0 : i64, scratch_operands = 0 : i64, tpu.core_type = #tpu.core_type<tc>, window_params = [{transform_indices = @transform_0, window_bounds = array<i64: 32, 48>}, {pipeline_mode = #tpu.pipeline_mode<synchronous>, transform_indices = @transform_1, window_bounds = array<i64: 48, 128>}, {pipeline_mode = #tpu.pipeline_mode<synchronous>, transform_indices = @transform_2, window_bounds = array<i64: 1, 128>}, {transform_indices = @transform_3, window_bounds = array<i64: 32, 128>}]} {
    %c0 = arith.constant 0 : index
    %c0_0 = arith.constant 0 : index
    %0 = vector.load %arg1[%c0, %c0_0] : memref<32x48xbf16, #tpu.memory_space<vmem>>, vector<32x48xbf16>
    %c0_1 = arith.constant 0 : index
    %c0_2 = arith.constant 0 : index
    %1 = vector.load %arg2[%c0_1, %c0_2] : memref<48x128xbf16, #tpu.memory_space<vmem>>, vector<48x128xbf16>
    %cst = arith.constant dense<0.000000e+00> : vector<32x128xf32>
    %2 = tpu.matmul %0, %1, %cst {dimension_numbers = #tpu.dot_dimension_numbers<[1], [0], [0], [1], [0, 0, 1, 1], [], []>} : vector<32x48xbf16>, vector<48x128xbf16>, vector<32x128xf32> -> vector<32x128xf32>
    %c0_3 = arith.constant 0 : index
    %c0_4 = arith.constant 0 : index
    %3 = vector.load %arg3[%c0_3, %c0_4] : memref<1x128xf32, #tpu.memory_space<vmem>>, vector<1x128xf32>
    %4 = vector.broadcast %3 : vector<1x128xf32> to vector<32x128xf32>
    %5 = arith.addf %2, %4 : vector<32x128xf32>
    %c0_5 = arith.constant 0 : index
    %c0_6 = arith.constant 0 : index
    %6 = vector.load %arg4[%c0_5, %c0_6] : memref<32x128xf32, #tpu.memory_space<vmem>>, vector<32x128xf32>
    tpu.vector_store %arg4[%c0_5, %c0_6], %5 {strides = array<i32>} : memref<32x128xf32, #tpu.memory_space<vmem>>, vector<32x128xf32>,
    return
  }
  func.func @transform_0(%arg0: i32) -> (i32, i32) {
    %c0_i32 = arith.constant 0 : i32
    %c0_i32_0 = arith.constant 0 : i32
    return %arg0, %c0_i32 : i32, i32
  }
  func.func @transform_1(%arg0: i32) -> (i32, i32) {
    %c0_i32 = arith.constant 0 : i32
    %c0_i32_0 = arith.constant 0 : i32
    %c0_i32_1 = arith.constant 0 : i32
    return %c0_i32, %c0_i32_0 : i32, i32
  }
  func.func @transform_2(%arg0: i32) -> (i32, i32) {
    %c0_i32 = arith.constant 0 : i32
    %c0_i32_0 = arith.constant 0 : i32
    %c0_i32_1 = arith.constant 0 : i32
    return %c0_i32, %c0_i32_0 : i32, i32
  }
  func.func @transform_3(%arg0: i32) -> (i32, i32) {
    %c0_i32 = arith.constant 0 : i32
    %c0_i32_0 = arith.constant 0 : i32
    return %arg0, %c0_i32 : i32, i32
  }
}

</mosaic_0001>

<bundles_post_ra>
// kernel: image_embedding_forward.1
= control target key start
LH: loop header
LB: loop body
LE: loop exit
PB: predicated region body
PF: predicated region fallthrough
CT: control target
= control target key end

     0   :  { %vm61_vm0 = vcmask 392192   ;;  %s245_s0 = inlined_call_operand.vmem [shape: bf16[32,48], index: 0, kind: input, shape index: {}]   ;;  %s246_s1 = inlined_call_operand.vmem [shape: bf16[48,128], index: 1, kind: input, shape index: {}]   ;;  %s247_s2 = inlined_call_operand.vmem [shape: f32[1,128], index: 2, kind: input, shape index: {}]   ;;  %s248_s3 = inlined_call_operand.hbm [shape: f32[32,128], index: 3, kind: output, shape index: {}]  }
   0x1   :  { %v163_v0 = vld [vmem:[%s246_s1] sm:$0xff]   ;;  %v164_v1 = vld [vmem:[%s246_s1 + $0x8] sm:$0xff]   ;;  %v165_v3 = vld [vmem:[%s246_s1 + $0x10] sm:$0xff]  }
   0x2   :  { %150 = vmatprep.subr.bf16.mxu0 %v163_v0  ;;  %v166_v2 = vld [vmem:[%s245_s0] sm:$0xff]  }
   0x3   :  { %151 = vmatpush3.bf16.msra.mxu0 %v163_v0  ;;  %156 = vmatprep.mubr.msk.bf16.mxu0 %vm61_vm0, %v166_v2 }
   0x4   :  { %152 = vmatprep.subr.bf16.mxu0 %v164_v1 }
   0x5   :  { %8 = vsyncpa [#allocation3], 0  ;;  %v167_v4 = vld [vmem:[%s245_s0 + $0x8] sm:$0xff]   ;;  %v137_v5 = vld [vmem:[%s247_s2] ss:$0 sm:$0xff]  ;;  %s192_s24 = smov [#allocation2]  }
   0x6   :  { %s126_s25 = sshll.u32 %s192_s24, 4  ;;  %s127_s25 = int_to_ptr.vmem [resolvable:$true] %s126_s25 }
   0x7   :  { %153 = vmatpush3.bf16.msra.mxu0 %v164_v1  ;;  %s168_s0 = scalar_lea.vmem %s127_s25, 512  ;;  %p173_p1 = scmp.lt.s32.totalorder %s127_s25, %s127_s25 }
   0x8   :  { %154 = vmatprep.subr.bf16.mxu0 %v165_v3  ;;  %p169_p0 = scmp.ne.s32.totalorder %s127_s25, %s168_s0  ;;  %p174_p2 = scmp.lt.s32.totalorder %s168_s0, %s168_s0 }
   0xa   :  { %p175_p3 = por %p174_p2, %p173_p1 }
   0xb   :  { %155 = vmatpush3.bf16.msra.mxu0 %v165_v3 }
   0xc   :  { %p176_p4 = pnand %p175_p3, %p169_p0 }
   0xe   :  { %157 = vmatmul.mubr.msk.bf16.vlgmr.msra.gmra.mrb[0].mxu0 %vm61_vm0, %v167_v4 }
  0xe1   :  { %v158_v6 = vpop.f32.mrb[0].mxu0 }
  0xe2   :  { %v111_v7 = vadd.f32 %v158_v6, %v137_v5  ;;  %v102_v8 = vpop.f32.mrb[1].mxu0 }
  0xe3   :  { %v103_v9 = vadd.f32 %v137_v5, %v102_v8  ;;  %v159_v10 = vpop.f32.mrb[2].mxu0 }
  0xe4   :  { %119 = vst [vmem:[#allocation2 + $0x10] sm:$0xff] %v111_v7  ;;  %v114_v11 = vadd.f32 %v159_v10, %v137_v5  ;;  %v105_v12 = vpop.f32.mrb[3].mxu0 }
  0xe5   :  { %117 = vst [vmem:[#allocation2] sm:$0xff] %v103_v9  ;;  %v106_v13 = vadd.f32 %v137_v5, %v105_v12 }
  0xe6   :  { %120 = vst [vmem:[#allocation2 + $0x18] sm:$0xff] %v114_v11 }
  0xe7   :  { %118 = vst [vmem:[#allocation2 + $0x8] sm:$0xff] %v106_v13 }
  0xe8   :  { %179 = shalt.err (!%p176_p4)
}
  0xe9   :  { %s180_s26 = scalar_lea.hbm %s248_s3, 512 }
  0xea   :  { %p181_p5 = scmp.ne.s32.totalorder %s248_s3, %s180_s26  ;;  %p184_p6 = scmp.lt.u32.totalorder %s180_s26, %s248_s3 }
  0xec   :  { %p186_p7 = pnand %p184_p6, %p181_p5 }
  0xee   :  { %189 = shalt.err (!%p186_p7)
}
  0xef   :  { %s193_s4 = smov 128   ;;  %s194_s5 = smov 8  }
  0xf0   :  { %132 = dma.vmem_to_hbm [thread:$0]  %s127_s25, 512, %s248_s3, [#allocation3], %s193_s4, %s193_s4, %s194_s5  }
  0xf1   :  { %190 = dma.done.wait [#allocation3], 512  }
  0xf2   :  { %191 = vsyncadd [#allocation3], 4294966784 }
  0xf3   :  { %136 = vsyncpa [#allocation3], 1 }

</bundles_post_ra>
